<compile_context>
chip_gen: v7x
topology: tpu7x:2x2x1
jax: 0.10.0
libtpu: 0.0.40
codegen_flags: <defaults>
</compile_context>

<pallas_src>
import jax
import jax.numpy as jnp
from jax import lax
from jax.experimental import pallas as pl
from jax.experimental.pallas import tpu as pltpu
import numpy as np

# ---------------- model sizes (small, consistent with the module) ------------
SEQ_LEN = 8
EMBED_DIM = 32
HIDDEN_DIM = 32
VOCAB_SIZE = 16
TAGSET_SIZE = 8

B_TILE = 8                 # sentences per grid step (fills the 8 sublanes)
TAG_PAD = 128              # lane-dense padded tag dimension
NEG_BIG = -1.0e30          # pad-column bias so log_softmax ignores pad lanes


# ---------------------------- Pallas kernel ----------------------------------
def lstm_tagger_kernel(ids_ref, pre_table_ref, w_hh_ref, w_out_ref, b_out_ref,
                       out_ref):
    """One batch tile of B_TILE sentences.

    ids_ref       : (S*B, 1) int32, row = t*B + b  (token t of sentence b)
    pre_table_ref : (V, 4H)  precomputed  embedding @ W_ih + (b_ih + b_hh)
    w_hh_ref      : (H, 4H)  compact recurrent weights, gate order [i|f|g|o]
    w_out_ref     : (H, TAG_PAD)  hidden2tag (cols >= TAGSET are zero)
    b_out_ref     : (1, TAG_PAD)  bias (cols >= TAGSET are -1e30)
    out_ref       : (S*B, TAG_PAD) log-probabilities, row = t*B + b
    """
    S, B, H, V = SEQ_LEN, B_TILE, HIDDEN_DIM, VOCAB_SIZE
    SB = S * B

    # Fused embedding gather + input projection: one one-hot MXU matmul.
    ids = ids_ref[...]                                               # (SB, 1)
    onehot = (lax.broadcasted_iota(jnp.int32, (SB, V), 1) == ids
              ).astype(jnp.float32)                                  # (SB, V)
    pre = jnp.dot(onehot, pre_table_ref[...],
                  preferred_element_type=jnp.float32)                # (SB, 4H)

    w_hh = w_hh_ref[...]                                             # (H, 4H)

    # Recurrence: fully unrolled (S static); h/c stay as traced vreg values,
    # batch B_TILE fills the sublane dimension of every vreg.
    h = jnp.zeros((B, H), jnp.float32)
    c = jnp.zeros((B, H), jnp.float32)
    hs = []
    for t in range(S):
        gates = pre[t * B:(t + 1) * B, :] + jnp.dot(
            h, w_hh, preferred_element_type=jnp.float32)             # (B, 4H)
        i_g = jax.nn.sigmoid(gates[:, 0 * H:1 * H])
        f_g = jax.nn.sigmoid(gates[:, 1 * H:2 * H])
        g_g = jnp.tanh(gates[:, 2 * H:3 * H])
        o_g = jax.nn.sigmoid(gates[:, 3 * H:4 * H])
        c = f_g * c + i_g * g_g
        h = o_g * jnp.tanh(c)
        hs.append(h)
    hs_all = jnp.concatenate(hs, axis=0)                             # (SB, H)

    # hidden2tag (lane-dense padded) + log_softmax over the tag dimension.
    # Pad columns carry bias -1e30 -> exp underflows to 0, so they are inert.
    tag = jnp.dot(hs_all, w_out_ref[...],
                  preferred_element_type=jnp.float32) + b_out_ref[...]  # (SB, TAG_PAD)
    m = jnp.max(tag, axis=1, keepdims=True)
    lse = m + jnp.log(jnp.sum(jnp.exp(tag - m), axis=1, keepdims=True))
    out_ref[...] = tag - lse


# ------------------------------ wrappers --------------------------------------
def _forward_impl(sentences, kparams):
    """sentences: (B, S) int32 with B a multiple of B_TILE -> (B, S, TAGSET)."""
    B, S = sentences.shape
    assert B % B_TILE == 0 and S == SEQ_LEN
    num_tiles = B // B_TILE
    SB = S * B_TILE

    # Repack ids so each tile's rows are in (t, b) order: row = t*B_TILE + b.
    ids = sentences.astype(jnp.int32).reshape(num_tiles, B_TILE, S)
    ids = jnp.transpose(ids, (0, 2, 1)).reshape(num_tiles, SB, 1)

    flops_per_tile = (2 * SB * VOCAB_SIZE * 4 * HIDDEN_DIM            # one-hot
                      + SEQ_LEN * 2 * B_TILE * HIDDEN_DIM * 4 * HIDDEN_DIM
                      + 2 * SB * HIDDEN_DIM * TAG_PAD)
    transc_per_tile = SEQ_LEN * 5 * B_TILE * HIDDEN_DIM + SB * TAG_PAD + SB
    weight_bytes = 4 * (VOCAB_SIZE * 4 * HIDDEN_DIM
                        + HIDDEN_DIM * 4 * HIDDEN_DIM
                        + HIDDEN_DIM * TAG_PAD + TAG_PAD)
    io_bytes = num_tiles * (SB * 4 + SB * TAG_PAD * 4)

    out_pad = pl.pallas_call(
        lstm_tagger_kernel,
        out_shape=jax.ShapeDtypeStruct((num_tiles, SB, TAG_PAD), jnp.float32),
        grid=(num_tiles,),
        in_specs=[
            pl.BlockSpec((None, SB, 1), lambda i: (i, 0, 0)),          # ids
            pl.BlockSpec((VOCAB_SIZE, 4 * HIDDEN_DIM), lambda i: (0, 0)),
            pl.BlockSpec((HIDDEN_DIM, 4 * HIDDEN_DIM), lambda i: (0, 0)),
            pl.BlockSpec((HIDDEN_DIM, TAG_PAD), lambda i: (0, 0)),
            pl.BlockSpec((1, TAG_PAD), lambda i: (0, 0)),
        ],
        out_specs=pl.BlockSpec((None, SB, TAG_PAD), lambda i: (i, 0, 0)),
        compiler_params=pltpu.CompilerParams(
            dimension_semantics=("parallel",)),
        cost_estimate=pl.CostEstimate(
            flops=num_tiles * flops_per_tile,
            transcendentals=num_tiles * transc_per_tile,
            bytes_accessed=weight_bytes + io_bytes),
    )(ids, kparams["pre_table"], kparams["w_hh_t"],
      kparams["w_out_p"], kparams["b_out_p"])

    # (num_tiles, S*B_TILE, TAG_PAD) -> (B, S, TAGSET)
    out = out_pad.reshape(num_tiles, S, B_TILE, TAG_PAD)
    out = jnp.transpose(out, (0, 2, 1, 3)).reshape(B, S, TAG_PAD)
    return out[:, :, :TAGSET_SIZE]


_forward_jit = jax.jit(_forward_impl)


def lstm_tagger_forward_batched(sentences, kparams):
    """(B, S) int32 -> (B, S, TAGSET) log-probs; pads B to a multiple of B_TILE."""
    B = sentences.shape[0]
    B_pad = ((B + B_TILE - 1) // B_TILE) * B_TILE
    if B_pad != B:
        pad = jnp.zeros((B_pad - B, sentences.shape[1]), sentences.dtype)
        sentences = jnp.concatenate([sentences, pad], axis=0)
    return _forward_jit(sentences, kparams)[:B]


def lstm_tagger_forward(sentence, kparams):
    """Module-parity interface: one sentence (S,) -> (S, TAGSET)."""
    return lstm_tagger_forward_batched(sentence[None, :], kparams)[0]


# --------------------------- parameter init ----------------------------------
def init_params(key):
    ks = jax.random.split(key, 7)
    scale = 0.1
    H4 = 4 * HIDDEN_DIM
    # PyTorch layouts: weight_ih (4H, E), weight_hh (4H, H), hidden2tag (T, H).
    w_ih = scale * jax.random.normal(ks[0], (H4, EMBED_DIM), jnp.float32)
    w_hh = scale * jax.random.normal(ks[1], (H4, HIDDEN_DIM), jnp.float32)
    b_ih = scale * jax.random.normal(ks[2], (H4,), jnp.float32)
    b_hh = scale * jax.random.normal(ks[3], (H4,), jnp.float32)
    w_out = scale * jax.random.normal(ks[4], (TAGSET_SIZE, HIDDEN_DIM), jnp.float32)
    b_out = scale * jax.random.normal(ks[5], (TAGSET_SIZE,), jnp.float32)
    emb = scale * jax.random.normal(ks[6], (VOCAB_SIZE, EMBED_DIM), jnp.float32)
    return {
        "embedding": emb,
        "w_ih_t": jnp.transpose(w_ih),                      # (E, 4H)
        "w_hh_t": jnp.transpose(w_hh),                      # (H, 4H)
        "b_gates": (b_ih + b_hh).reshape(1, H4),            # (1, 4H)
        "w_out_t": jnp.transpose(w_out),                    # (H, T)
        "b_out": b_out.reshape(1, TAGSET_SIZE),             # (1, T)
    }


def prepare_kernel_params(params):
    """One-time host-side repack into the layout the kernel expects."""
    # Fused embedding + input projection table (includes both LSTM biases).
    pre_table = jnp.dot(params["embedding"], params["w_ih_t"],
                        precision=lax.Precision.HIGHEST) + params["b_gates"]
    # Lane-dense hidden2tag: zero weight columns / -1e30 bias for pad lanes.
    w_out_p = jnp.zeros((HIDDEN_DIM, TAG_PAD), jnp.float32)
    w_out_p = w_out_p.at[:, :TAGSET_SIZE].set(params["w_out_t"])
    b_out_p = jnp.full((1, TAG_PAD), NEG_BIG, jnp.float32)
    b_out_p = b_out_p.at[:, :TAGSET_SIZE].set(params["b_out"])
    return {
        "pre_table": pre_table,            # (V, 4H)
        "w_hh_t": params["w_hh_t"],        # (H, 4H)
        "w_out_p": w_out_p,                # (H, TAG_PAD)
        "b_out_p": b_out_p,                # (1, TAG_PAD)
    }


# ------------------------ pure-JAX reference (for check) ---------------------
def reference_forward(sentence, params):
    embeds = jnp.take(params["embedding"], sentence, axis=0)
    H = HIDDEN_DIM

    def step(carry, x_t):
        h, c = carry
        gates = (jnp.dot(x_t, params["w_ih_t"], precision=lax.Precision.HIGHEST)
                 + jnp.dot(h, params["w_hh_t"], precision=lax.Precision.HIGHEST)
                 + params["b_gates"][0])
        i = jax.nn.sigmoid(gates[0:H])
        f = jax.nn.sigmoid(gates[H:2 * H])
        g = jnp.tanh(gates[2 * H:3 * H])
        o = jax.nn.sigmoid(gates[3 * H:4 * H])
        c_new = f * c + i * g
        h_new = o * jnp.tanh(c_new)
        return (h_new, c_new), h_new

    (_, _), hs = lax.scan(step, (jnp.zeros(H), jnp.zeros(H)), embeds)
    tag = jnp.dot(hs, params["w_out_t"],
                  precision=lax.Precision.HIGHEST) + params["b_out"]
    return jax.nn.log_softmax(tag, axis=1)


# ------------------------------------ main ------------------------------------
if __name__ == "__main__":
    BATCH = 16                      # two grid tiles -> exercises the parallel axis

    key = jax.random.PRNGKey(0)
    pkey, skey = jax.random.split(key)
    params = init_params(pkey)
    kparams = prepare_kernel_params(params)
    sentences = jax.random.randint(skey, (BATCH, SEQ_LEN), 0, VOCAB_SIZE,
                                   dtype=jnp.int32)

    out = jax.block_until_ready(lstm_tagger_forward_batched(sentences, kparams))
    ref = jax.block_until_ready(
        jax.vmap(lambda s: reference_forward(s, params))(sentences))

    assert out.shape == (BATCH, SEQ_LEN, TAGSET_SIZE)
    # f32 everywhere; tolerance allows for MXU multi-pass / EUP transcendental
    # differences vs the XLA reference.
    np.testing.assert_allclose(np.asarray(out), np.asarray(ref),
                               rtol=1e-4, atol=1e-4)

    # Module-parity single-sentence interface.
    single = jax.block_until_ready(lstm_tagger_forward(sentences[0], kparams))
    np.testing.assert_allclose(np.asarray(single), np.asarray(ref[0]),
                               rtol=1e-4, atol=1e-4)

    print("KERNEL_OK")
</pallas_src>

<mosaic_0001>
module attributes {stable_mosaic.version = 11 : i64} {
  func.func @lstm_tagger_kernel(%arg0: i32, %arg1: memref<1x64x1xi32, #tpu.memory_space<vmem>>, %arg2: memref<16x128xf32, #tpu.memory_space<vmem>>, %arg3: memref<32x128xf32, #tpu.memory_space<vmem>>, %arg4: memref<32x128xf32, #tpu.memory_space<vmem>>, %arg5: memref<1x128xf32, #tpu.memory_space<vmem>>, %arg6: memref<1x64x128xf32, #tpu.memory_space<vmem>>) attributes {dimension_semantics = [#tpu.dimension_semantics<parallel>], iteration_bounds = array<i64: 2>, scalar_prefetch = 0 : i64, scratch_operands = 0 : i64, tpu.core_type = #tpu.core_type<tc>, window_params = [{transform_indices = @transform_0, window_bounds = array<i64: 1, 64, 1>}, {pipeline_mode = #tpu.pipeline_mode<synchronous>, transform_indices = @transform_1, window_bounds = array<i64: 16, 128>}, {pipeline_mode = #tpu.pipeline_mode<synchronous>, transform_indices = @transform_2, window_bounds = array<i64: 32, 128>}, {pipeline_mode = #tpu.pipeline_mode<synchronous>, transform_indices = @transform_3, window_bounds = array<i64: 32, 128>}, {pipeline_mode = #tpu.pipeline_mode<synchronous>, transform_indices = @transform_4, window_bounds = array<i64: 1, 128>}, {transform_indices = @transform_5, window_bounds = array<i64: 1, 64, 128>}]} {
    %c0 = arith.constant 0 : index
    %c0_0 = arith.constant 0 : index
    %c0_1 = arith.constant 0 : index
    %0 = vector.load %arg1[%c0, %c0_0, %c0_1] : memref<1x64x1xi32, #tpu.memory_space<vmem>>, vector<1x64x1xi32>
    %1 = vector.shape_cast %0 : vector<1x64x1xi32> to vector<64x1xi32>
    %2 = tpu.iota {dimensions = array<i32: 1>} : vector<64x16xi32>
    %3 = vector.broadcast %1 : vector<64x1xi32> to vector<64x16xi32>
    %4 = arith.cmpi eq, %2, %3 : vector<64x16xi32>
    %5 = arith.extui %4 : vector<64x16xi1> to vector<64x16xi32>
    %6 = arith.sitofp %5 : vector<64x16xi32> to vector<64x16xf32>
    %c0_2 = arith.constant 0 : index
    %c0_3 = arith.constant 0 : index
    %7 = vector.load %arg2[%c0_2, %c0_3] : memref<16x128xf32, #tpu.memory_space<vmem>>, vector<16x128xf32>
    %cst = arith.constant dense<0.000000e+00> : vector<64x128xf32>
    %8 = tpu.matmul %6, %7, %cst {dimension_numbers = #tpu.dot_dimension_numbers<[1], [0], [0], [1], [0, 0, 1, 1], [], []>} : vector<64x16xf32>, vector<16x128xf32>, vector<64x128xf32> -> vector<64x128xf32>
    %c0_4 = arith.constant 0 : index
    %c0_5 = arith.constant 0 : index
    %9 = vector.load %arg3[%c0_4, %c0_5] : memref<32x128xf32, #tpu.memory_space<vmem>>, vector<32x128xf32>
    %cst_6 = arith.constant 0.000000e+00 : f32
    %10 = vector.broadcast %cst_6 : f32 to vector<8x32xf32>
    %cst_7 = arith.constant 0.000000e+00 : f32
    %11 = vector.broadcast %cst_7 : f32 to vector<8x32xf32>
    %12 = vector.extract_strided_slice %8 {offsets = [0, 0], sizes = [8, 128], strides = [1, 1]} : vector<64x128xf32> to vector<8x128xf32>
    %cst_8 = arith.constant dense<0.000000e+00> : vector<8x128xf32>
    %13 = tpu.matmul %10, %9, %cst_8 {dimension_numbers = #tpu.dot_dimension_numbers<[1], [0], [0], [1], [0, 0, 1, 1], [], []>} : vector<8x32xf32>, vector<32x128xf32>, vector<8x128xf32> -> vector<8x128xf32>
    %14 = arith.addf %12, %13 : vector<8x128xf32>
    %15 = vector.extract_strided_slice %14 {offsets = [0, 0], sizes = [8, 32], strides = [1, 1]} : vector<8x128xf32> to vector<8x32xf32>
    %16 = arith.negf %15 : vector<8x32xf32>
    %17 = math.exp %16 : vector<8x32xf32>
    %cst_9 = arith.constant 1.000000e+00 : f32
    %18 = vector.broadcast %cst_9 : f32 to vector<8x32xf32>
    %19 = arith.addf %18, %17 : vector<8x32xf32>
    %20 = arith.divf %18, %19 : vector<8x32xf32>
    %21 = vector.extract_strided_slice %14 {offsets = [0, 32], sizes = [8, 32], strides = [1, 1]} : vector<8x128xf32> to vector<8x32xf32>
    %22 = arith.negf %21 : vector<8x32xf32>
    %23 = math.exp %22 : vector<8x32xf32>
    %cst_10 = arith.constant 1.000000e+00 : f32
    %24 = vector.broadcast %cst_10 : f32 to vector<8x32xf32>
    %25 = arith.addf %24, %23 : vector<8x32xf32>
    %26 = arith.divf %24, %25 : vector<8x32xf32>
    %27 = vector.extract_strided_slice %14 {offsets = [0, 64], sizes = [8, 32], strides = [1, 1]} : vector<8x128xf32> to vector<8x32xf32>
    %28 = math.tanh %27 : vector<8x32xf32>
    %29 = vector.extract_strided_slice %14 {offsets = [0, 96], sizes = [8, 32], strides = [1, 1]} : vector<8x128xf32> to vector<8x32xf32>
    %30 = arith.negf %29 : vector<8x32xf32>
    %31 = math.exp %30 : vector<8x32xf32>
    %cst_11 = arith.constant 1.000000e+00 : f32
    %32 = vector.broadcast %cst_11 : f32 to vector<8x32xf32>
    %33 = arith.addf %32, %31 : vector<8x32xf32>
    %34 = arith.divf %32, %33 : vector<8x32xf32>
    %35 = arith.mulf %26, %11 : vector<8x32xf32>
    %36 = arith.mulf %20, %28 : vector<8x32xf32>
    %37 = arith.addf %35, %36 : vector<8x32xf32>
    %38 = math.tanh %37 : vector<8x32xf32>
    %39 = arith.mulf %34, %38 : vector<8x32xf32>
    %40 = vector.extract_strided_slice %8 {offsets = [8, 0], sizes = [8, 128], strides = [1, 1]} : vector<64x128xf32> to vector<8x128xf32>
    %cst_12 = arith.constant dense<0.000000e+00> : vector<8x128xf32>
    %41 = tpu.matmul %39, %9, %cst_12 {dimension_numbers = #tpu.dot_dimension_numbers<[1], [0], [0], [1], [0, 0, 1, 1], [], []>} : vector<8x32xf32>, vector<32x128xf32>, vector<8x128xf32> -> vector<8x128xf32>
    %42 = arith.addf %40, %41 : vector<8x128xf32>
    %43 = vector.extract_strided_slice %42 {offsets = [0, 0], sizes = [8, 32], strides = [1, 1]} : vector<8x128xf32> to vector<8x32xf32>
    %44 = arith.negf %43 : vector<8x32xf32>
    %45 = math.exp %44 : vector<8x32xf32>
    %cst_13 = arith.constant 1.000000e+00 : f32
    %46 = vector.broadcast %cst_13 : f32 to vector<8x32xf32>
    %47 = arith.addf %46, %45 : vector<8x32xf32>
    %48 = arith.divf %46, %47 : vector<8x32xf32>
    %49 = vector.extract_strided_slice %42 {offsets = [0, 32], sizes = [8, 32], strides = [1, 1]} : vector<8x128xf32> to vector<8x32xf32>
    %50 = arith.negf %49 : vector<8x32xf32>
    %51 = math.exp %50 : vector<8x32xf32>
    %cst_14 = arith.constant 1.000000e+00 : f32
    %52 = vector.broadcast %cst_14 : f32 to vector<8x32xf32>
    %53 = arith.addf %52, %51 : vector<8x32xf32>
    %54 = arith.divf %52, %53 : vector<8x32xf32>
    %55 = vector.extract_strided_slice %42 {offsets = [0, 64], sizes = [8, 32], strides = [1, 1]} : vector<8x128xf32> to vector<8x32xf32>
    %56 = math.tanh %55 : vector<8x32xf32>
    %57 = vector.extract_strided_slice %42 {offsets = [0, 96], sizes = [8, 32], strides = [1, 1]} : vector<8x128xf32> to vector<8x32xf32>
    %58 = arith.negf %57 : vector<8x32xf32>
    %59 = math.exp %58 : vector<8x32xf32>
    %cst_15 = arith.constant 1.000000e+00 : f32
    %60 = vector.broadcast %cst_15 : f32 to vector<8x32xf32>
    %61 = arith.addf %60, %59 : vector<8x32xf32>
    %62 = arith.divf %60, %61 : vector<8x32xf32>
    %63 = arith.mulf %54, %37 : vector<8x32xf32>
    %64 = arith.mulf %48, %56 : vector<8x32xf32>
    %65 = arith.addf %63, %64 : vector<8x32xf32>
    %66 = math.tanh %65 : vector<8x32xf32>
    %67 = arith.mulf %62, %66 : vector<8x32xf32>
    %68 = vector.extract_strided_slice %8 {offsets = [16, 0], sizes = [8, 128], strides = [1, 1]} : vector<64x128xf32> to vector<8x128xf32>
    %cst_16 = arith.constant dense<0.000000e+00> : vector<8x128xf32>
    %69 = tpu.matmul %67, %9, %cst_16 {dimension_numbers = #tpu.dot_dimension_numbers<[1], [0], [0], [1], [0, 0, 1, 1], [], []>} : vector<8x32xf32>, vector<32x128xf32>, vector<8x128xf32> -> vector<8x128xf32>
    %70 = arith.addf %68, %69 : vector<8x128xf32>
    %71 = vector.extract_strided_slice %70 {offsets = [0, 0], sizes = [8, 32], strides = [1, 1]} : vector<8x128xf32> to vector<8x32xf32>
    %72 = arith.negf %71 : vector<8x32xf32>
    %73 = math.exp %72 : vector<8x32xf32>
    %cst_17 = arith.constant 1.000000e+00 : f32
    %74 = vector.broadcast %cst_17 : f32 to vector<8x32xf32>
    %75 = arith.addf %74, %73 : vector<8x32xf32>
    %76 = arith.divf %74, %75 : vector<8x32xf32>
    %77 = vector.extract_strided_slice %70 {offsets = [0, 32], sizes = [8, 32], strides = [1, 1]} : vector<8x128xf32> to vector<8x32xf32>
    %78 = arith.negf %77 : vector<8x32xf32>
    %79 = math.exp %78 : vector<8x32xf32>
    %cst_18 = arith.constant 1.000000e+00 : f32
    %80 = vector.broadcast %cst_18 : f32 to vector<8x32xf32>
    %81 = arith.addf %80, %79 : vector<8x32xf32>
    %82 = arith.divf %80, %81 : vector<8x32xf32>
    %83 = vector.extract_strided_slice %70 {offsets = [0, 64], sizes = [8, 32], strides = [1, 1]} : vector<8x128xf32> to vector<8x32xf32>
    %84 = math.tanh %83 : vector<8x32xf32>
    %85 = vector.extract_strided_slice %70 {offsets = [0, 96], sizes = [8, 32], strides = [1, 1]} : vector<8x128xf32> to vector<8x32xf32>
    %86 = arith.negf %85 : vector<8x32xf32>
    %87 = math.exp %86 : vector<8x32xf32>
    %cst_19 = arith.constant 1.000000e+00 : f32
    %88 = vector.broadcast %cst_19 : f32 to vector<8x32xf32>
    %89 = arith.addf %88, %87 : vector<8x32xf32>
    %90 = arith.divf %88, %89 : vector<8x32xf32>
    %91 = arith.mulf %82, %65 : vector<8x32xf32>
    %92 = arith.mulf %76, %84 : vector<8x32xf32>
    %93 = arith.addf %91, %92 : vector<8x32xf32>
    %94 = math.tanh %93 : vector<8x32xf32>
    %95 = arith.mulf %90, %94 : vector<8x32xf32>
    %96 = vector.extract_strided_slice %8 {offsets = [24, 0], sizes = [8, 128], strides = [1, 1]} : vector<64x128xf32> to vector<8x128xf32>
    %cst_20 = arith.constant dense<0.000000e+00> : vector<8x128xf32>
    %97 = tpu.matmul %95, %9, %cst_20 {dimension_numbers = #tpu.dot_dimension_numbers<[1], [0], [0], [1], [0, 0, 1, 1], [], []>} : vector<8x32xf32>, vector<32x128xf32>, vector<8x128xf32> -> vector<8x128xf32>
    %98 = arith.addf %96, %97 : vector<8x128xf32>
    %99 = vector.extract_strided_slice %98 {offsets = [0, 0], sizes = [8, 32], strides = [1, 1]} : vector<8x128xf32> to vector<8x32xf32>
    %100 = arith.negf %99 : vector<8x32xf32>
    %101 = math.exp %100 : vector<8x32xf32>
    %cst_21 = arith.constant 1.000000e+00 : f32
    %102 = vector.broadcast %cst_21 : f32 to vector<8x32xf32>
    %103 = arith.addf %102, %101 : vector<8x32xf32>
    %104 = arith.divf %102, %103 : vector<8x32xf32>
    %105 = vector.extract_strided_slice %98 {offsets = [0, 32], sizes = [8, 32], strides = [1, 1]} : vector<8x128xf32> to vector<8x32xf32>
    %106 = arith.negf %105 : vector<8x32xf32>
    %107 = math.exp %106 : vector<8x32xf32>
    %cst_22 = arith.constant 1.000000e+00 : f32
    %108 = vector.broadcast %cst_22 : f32 to vector<8x32xf32>
    %109 = arith.addf %108, %107 : vector<8x32xf32>
    %110 = arith.divf %108, %109 : vector<8x32xf32>
    %111 = vector.extract_strided_slice %98 {offsets = [0, 64], sizes = [8, 32], strides = [1, 1]} : vector<8x128xf32> to vector<8x32xf32>
    %112 = math.tanh %111 : vector<8x32xf32>
    %113 = vector.extract_strided_slice %98 {offsets = [0, 96], sizes = [8, 32], strides = [1, 1]} : vector<8x128xf32> to vector<8x32xf32>
    %114 = arith.negf %113 : vector<8x32xf32>
    %115 = math.exp %114 : vector<8x32xf32>
    %cst_23 = arith.constant 1.000000e+00 : f32
    %116 = vector.broadcast %cst_23 : f32 to vector<8x32xf32>
    %117 = arith.addf %116, %115 : vector<8x32xf32>
    %118 = arith.divf %116, %117 : vector<8x32xf32>
    %119 = arith.mulf %110, %93 : vector<8x32xf32>
    %120 = arith.mulf %104, %112 : vector<8x32xf32>
    %121 = arith.addf %119, %120 : vector<8x32xf32>
    %122 = math.tanh %121 : vector<8x32xf32>
    %123 = arith.mulf %118, %122 : vector<8x32xf32>
    %124 = vector.extract_strided_slice %8 {offsets = [32, 0], sizes = [8, 128], strides = [1, 1]} : vector<64x128xf32> to vector<8x128xf32>
    %cst_24 = arith.constant dense<0.000000e+00> : vector<8x128xf32>
    %125 = tpu.matmul %123, %9, %cst_24 {dimension_numbers = #tpu.dot_dimension_numbers<[1], [0], [0], [1], [0, 0, 1, 1], [], []>} : vector<8x32xf32>, vector<32x128xf32>, vector<8x128xf32> -> vector<8x128xf32>
    %126 = arith.addf %124, %125 : vector<8x128xf32>
    %127 = vector.extract_strided_slice %126 {offsets = [0, 0], sizes = [8, 32], strides = [1, 1]} : vector<8x128xf32> to vector<8x32xf32>
    %128 = arith.negf %127 : vector<8x32xf32>
    %129 = math.exp %128 : vector<8x32xf32>
    %cst_25 = arith.constant 1.000000e+00 : f32
    %130 = vector.broadcast %cst_25 : f32 to vector<8x32xf32>
    %131 = arith.addf %130, %129 : vector<8x32xf32>
    %132 = arith.divf %130, %131 : vector<8x32xf32>
    %133 = vector.extract_strided_slice %126 {offsets = [0, 32], sizes = [8, 32], strides = [1, 1]} : vector<8x128xf32> to vector<8x32xf32>
    %134 = arith.negf %133 : vector<8x32xf32>
    %135 = math.exp %134 : vector<8x32xf32>
    %cst_26 = arith.constant 1.000000e+00 : f32
    %136 = vector.broadcast %cst_26 : f32 to vector<8x32xf32>
    %137 = arith.addf %136, %135 : vector<8x32xf32>
    %138 = arith.divf %136, %137 : vector<8x32xf32>
    %139 = vector.extract_strided_slice %126 {offsets = [0, 64], sizes = [8, 32], strides = [1, 1]} : vector<8x128xf32> to vector<8x32xf32>
    %140 = math.tanh %139 : vector<8x32xf32>
    %141 = vector.extract_strided_slice %126 {offsets = [0, 96], sizes = [8, 32], strides = [1, 1]} : vector<8x128xf32> to vector<8x32xf32>
    %142 = arith.negf %141 : vector<8x32xf32>
    %143 = math.exp %142 : vector<8x32xf32>
    %cst_27 = arith.constant 1.000000e+00 : f32
    %144 = vector.broadcast %cst_27 : f32 to vector<8x32xf32>
    %145 = arith.addf %144, %143 : vector<8x32xf32>
    %146 = arith.divf %144, %145 : vector<8x32xf32>
    %147 = arith.mulf %138, %121 : vector<8x32xf32>
    %148 = arith.mulf %132, %140 : vector<8x32xf32>
    %149 = arith.addf %147, %148 : vector<8x32xf32>
    %150 = math.tanh %149 : vector<8x32xf32>
    %151 = arith.mulf %146, %150 : vector<8x32xf32>
    %152 = vector.extract_strided_slice %8 {offsets = [40, 0], sizes = [8, 128], strides = [1, 1]} : vector<64x128xf32> to vector<8x128xf32>
    %cst_28 = arith.constant dense<0.000000e+00> : vector<8x128xf32>
    %153 = tpu.matmul %151, %9, %cst_28 {dimension_numbers = #tpu.dot_dimension_numbers<[1], [0], [0], [1], [0, 0, 1, 1], [], []>} : vector<8x32xf32>, vector<32x128xf32>, vector<8x128xf32> -> vector<8x128xf32>
    %154 = arith.addf %152, %153 : vector<8x128xf32>
    %155 = vector.extract_strided_slice %154 {offsets = [0, 0], sizes = [8, 32], strides = [1, 1]} : vector<8x128xf32> to vector<8x32xf32>
    %156 = arith.negf %155 : vector<8x32xf32>
    %157 = math.exp %156 : vector<8x32xf32>
    %cst_29 = arith.constant 1.000000e+00 : f32
    %158 = vector.broadcast %cst_29 : f32 to vector<8x32xf32>
    %159 = arith.addf %158, %157 : vector<8x32xf32>
    %160 = arith.divf %158, %159 : vector<8x32xf32>
    %161 = vector.extract_strided_slice %154 {offsets = [0, 32], sizes = [8, 32], strides = [1, 1]} : vector<8x128xf32> to vector<8x32xf32>
    %162 = arith.negf %161 : vector<8x32xf32>
    %163 = math.exp %162 : vector<8x32xf32>
    %cst_30 = arith.constant 1.000000e+00 : f32
    %164 = vector.broadcast %cst_30 : f32 to vector<8x32xf32>
    %165 = arith.addf %164, %163 : vector<8x32xf32>
    %166 = arith.divf %164, %165 : vector<8x32xf32>
    %167 = vector.extract_strided_slice %154 {offsets = [0, 64], sizes = [8, 32], strides = [1, 1]} : vector<8x128xf32> to vector<8x32xf32>
    %168 = math.tanh %167 : vector<8x32xf32>
    %169 = vector.extract_strided_slice %154 {offsets = [0, 96], sizes = [8, 32], strides = [1, 1]} : vector<8x128xf32> to vector<8x32xf32>
    %170 = arith.negf %169 : vector<8x32xf32>
    %171 = math.exp %170 : vector<8x32xf32>
    %cst_31 = arith.constant 1.000000e+00 : f32
    %172 = vector.broadcast %cst_31 : f32 to vector<8x32xf32>
    %173 = arith.addf %172, %171 : vector<8x32xf32>
    %174 = arith.divf %172, %173 : vector<8x32xf32>
    %175 = arith.mulf %166, %149 : vector<8x32xf32>
    %176 = arith.mulf %160, %168 : vector<8x32xf32>
    %177 = arith.addf %175, %176 : vector<8x32xf32>
    %178 = math.tanh %177 : vector<8x32xf32>
    %179 = arith.mulf %174, %178 : vector<8x32xf32>
    %180 = vector.extract_strided_slice %8 {offsets = [48, 0], sizes = [8, 128], strides = [1, 1]} : vector<64x128xf32> to vector<8x128xf32>
    %cst_32 = arith.constant dense<0.000000e+00> : vector<8x128xf32>
    %181 = tpu.matmul %179, %9, %cst_32 {dimension_numbers = #tpu.dot_dimension_numbers<[1], [0], [0], [1], [0, 0, 1, 1], [], []>} : vector<8x32xf32>, vector<32x128xf32>, vector<8x128xf32> -> vector<8x128xf32>
    %182 = arith.addf %180, %181 : vector<8x128xf32>
    %183 = vector.extract_strided_slice %182 {offsets = [0, 0], sizes = [8, 32], strides = [1, 1]} : vector<8x128xf32> to vector<8x32xf32>
    %184 = arith.negf %183 : vector<8x32xf32>
    %185 = math.exp %184 : vector<8x32xf32>
    %cst_33 = arith.constant 1.000000e+00 : f32
    %186 = vector.broadcast %cst_33 : f32 to vector<8x32xf32>
    %187 = arith.addf %186, %185 : vector<8x32xf32>
    %188 = arith.divf %186, %187 : vector<8x32xf32>
    %189 = vector.extract_strided_slice %182 {offsets = [0, 32], sizes = [8, 32], strides = [1, 1]} : vector<8x128xf32> to vector<8x32xf32>
    %190 = arith.negf %189 : vector<8x32xf32>
    %191 = math.exp %190 : vector<8x32xf32>
    %cst_34 = arith.constant 1.000000e+00 : f32
    %192 = vector.broadcast %cst_34 : f32 to vector<8x32xf32>
    %193 = arith.addf %192, %191 : vector<8x32xf32>
    %194 = arith.divf %192, %193 : vector<8x32xf32>
    %195 = vector.extract_strided_slice %182 {offsets = [0, 64], sizes = [8, 32], strides = [1, 1]} : vector<8x128xf32> to vector<8x32xf32>
    %196 = math.tanh %195 : vector<8x32xf32>
    %197 = vector.extract_strided_slice %182 {offsets = [0, 96], sizes = [8, 32], strides = [1, 1]} : vector<8x128xf32> to vector<8x32xf32>
    %198 = arith.negf %197 : vector<8x32xf32>
    %199 = math.exp %198 : vector<8x32xf32>
    %cst_35 = arith.constant 1.000000e+00 : f32
    %200 = vector.broadcast %cst_35 : f32 to vector<8x32xf32>
    %201 = arith.addf %200, %199 : vector<8x32xf32>
    %202 = arith.divf %200, %201 : vector<8x32xf32>
    %203 = arith.mulf %194, %177 : vector<8x32xf32>
    %204 = arith.mulf %188, %196 : vector<8x32xf32>
    %205 = arith.addf %203, %204 : vector<8x32xf32>
    %206 = math.tanh %205 : vector<8x32xf32>
    %207 = arith.mulf %202, %206 : vector<8x32xf32>
    %208 = vector.extract_strided_slice %8 {offsets = [56, 0], sizes = [8, 128], strides = [1, 1]} : vector<64x128xf32> to vector<8x128xf32>
    %cst_36 = arith.constant dense<0.000000e+00> : vector<8x128xf32>
    %209 = tpu.matmul %207, %9, %cst_36 {dimension_numbers = #tpu.dot_dimension_numbers<[1], [0], [0], [1], [0, 0, 1, 1], [], []>} : vector<8x32xf32>, vector<32x128xf32>, vector<8x128xf32> -> vector<8x128xf32>
    %210 = arith.addf %208, %209 : vector<8x128xf32>
    %211 = vector.extract_strided_slice %210 {offsets = [0, 0], sizes = [8, 32], strides = [1, 1]} : vector<8x128xf32> to vector<8x32xf32>
    %212 = arith.negf %211 : vector<8x32xf32>
    %213 = math.exp %212 : vector<8x32xf32>
    %cst_37 = arith.constant 1.000000e+00 : f32
    %214 = vector.broadcast %cst_37 : f32 to vector<8x32xf32>
    %215 = arith.addf %214, %213 : vector<8x32xf32>
    %216 = arith.divf %214, %215 : vector<8x32xf32>
    %217 = vector.extract_strided_slice %210 {offsets = [0, 32], sizes = [8, 32], strides = [1, 1]} : vector<8x128xf32> to vector<8x32xf32>
    %218 = arith.negf %217 : vector<8x32xf32>
    %219 = math.exp %218 : vector<8x32xf32>
    %cst_38 = arith.constant 1.000000e+00 : f32
    %220 = vector.broadcast %cst_38 : f32 to vector<8x32xf32>
    %221 = arith.addf %220, %219 : vector<8x32xf32>
    %222 = arith.divf %220, %221 : vector<8x32xf32>
    %223 = vector.extract_strided_slice %210 {offsets = [0, 64], sizes = [8, 32], strides = [1, 1]} : vector<8x128xf32> to vector<8x32xf32>
    %224 = math.tanh %223 : vector<8x32xf32>
    %225 = vector.extract_strided_slice %210 {offsets = [0, 96], sizes = [8, 32], strides = [1, 1]} : vector<8x128xf32> to vector<8x32xf32>
    %226 = arith.negf %225 : vector<8x32xf32>
    %227 = math.exp %226 : vector<8x32xf32>
    %cst_39 = arith.constant 1.000000e+00 : f32
    %228 = vector.broadcast %cst_39 : f32 to vector<8x32xf32>
    %229 = arith.addf %228, %227 : vector<8x32xf32>
    %230 = arith.divf %228, %229 : vector<8x32xf32>
    %231 = arith.mulf %222, %205 : vector<8x32xf32>
    %232 = arith.mulf %216, %224 : vector<8x32xf32>
    %233 = arith.addf %231, %232 : vector<8x32xf32>
    %234 = math.tanh %233 : vector<8x32xf32>
    %235 = arith.mulf %230, %234 : vector<8x32xf32>
    %236 = tpu.concatenate %39, %67, %95, %123, %151, %179, %207, %235 in 0 : vector<8x32xf32>, vector<8x32xf32>, vector<8x32xf32>, vector<8x32xf32>, vector<8x32xf32>, vector<8x32xf32>, vector<8x32xf32>, vector<8x32xf32> -> vector<64x32xf32>
    %c0_40 = arith.constant 0 : index
    %c0_41 = arith.constant 0 : index
    %237 = vector.load %arg4[%c0_40, %c0_41] : memref<32x128xf32, #tpu.memory_space<vmem>>, vector<32x128xf32>
    %cst_42 = arith.constant dense<0.000000e+00> : vector<64x128xf32>
    %238 = tpu.matmul %236, %237, %cst_42 {dimension_numbers = #tpu.dot_dimension_numbers<[1], [0], [0], [1], [0, 0, 1, 1], [], []>} : vector<64x32xf32>, vector<32x128xf32>, vector<64x128xf32> -> vector<64x128xf32>
    %c0_43 = arith.constant 0 : index
    %c0_44 = arith.constant 0 : index
    %239 = vector.load %arg5[%c0_43, %c0_44] : memref<1x128xf32, #tpu.memory_space<vmem>>, vector<1x128xf32>
    %240 = vector.broadcast %239 : vector<1x128xf32> to vector<64x128xf32>
    %241 = arith.addf %238, %240 : vector<64x128xf32>
    %cst_45 = arith.constant dense<0xFF800000> : vector<64xf32>
    %242 = vector.multi_reduction <maximumf>, %241, %cst_45 [1] : vector<64x128xf32> to vector<64xf32>
    %243 = vector.shape_cast %242 : vector<64xf32> to vector<64x1xf32>
    %244 = vector.broadcast %243 : vector<64x1xf32> to vector<64x128xf32>
    %245 = arith.subf %241, %244 : vector<64x128xf32>
    %246 = math.exp %245 : vector<64x128xf32>
    %cst_46 = arith.constant dense<0.000000e+00> : vector<64xf32>
    %247 = vector.multi_reduction <add>, %246, %cst_46 [1] : vector<64x128xf32> to vector<64xf32>
    %248 = vector.shape_cast %247 : vector<64xf32> to vector<64x1xf32>
    %249 = math.log %248 : vector<64x1xf32>
    %250 = arith.addf %243, %249 : vector<64x1xf32>
    %251 = vector.broadcast %250 : vector<64x1xf32> to vector<64x128xf32>
    %252 = arith.subf %241, %251 : vector<64x128xf32>
    %c0_47 = arith.constant 0 : index
    %c0_48 = arith.constant 0 : index
    %c0_49 = arith.constant 0 : index
    %253 = vector.load %arg6[%c0_47, %c0_48, %c0_49] : memref<1x64x128xf32, #tpu.memory_space<vmem>>, vector<1x64x128xf32>
    %254 = vector.shape_cast %253 : vector<1x64x128xf32> to vector<64x128xf32>
    %255 = vector.shape_cast %252 : vector<64x128xf32> to vector<1x64x128xf32>
    tpu.vector_store %arg6[%c0_47, %c0_48, %c0_49], %255 {strides = array<i32>} : memref<1x64x128xf32, #tpu.memory_space<vmem>>, vector<1x64x128xf32>,
    return
  }
  func.func @transform_0(%arg0: i32) -> (i32, i32, i32) {
    %c0_i32 = arith.constant 0 : i32
    %c0_i32_0 = arith.constant 0 : i32
    %c0_i32_1 = arith.constant 0 : i32
    return %arg0, %c0_i32, %c0_i32_0 : i32, i32, i32
  }
  func.func @transform_1(%arg0: i32) -> (i32, i32) {
    %c0_i32 = arith.constant 0 : i32
    %c0_i32_0 = arith.constant 0 : i32
    %c0_i32_1 = arith.constant 0 : i32
    return %c0_i32, %c0_i32_0 : i32, i32
  }
  func.func @transform_2(%arg0: i32) -> (i32, i32) {
    %c0_i32 = arith.constant 0 : i32
    %c0_i32_0 = arith.constant 0 : i32
    %c0_i32_1 = arith.constant 0 : i32
    return %c0_i32, %c0_i32_0 : i32, i32
  }
  func.func @transform_3(%arg0: i32) -> (i32, i32) {
    %c0_i32 = arith.constant 0 : i32
    %c0_i32_0 = arith.constant 0 : i32
    %c0_i32_1 = arith.constant 0 : i32
    return %c0_i32, %c0_i32_0 : i32, i32
  }
  func.func @transform_4(%arg0: i32) -> (i32, i32) {
    %c0_i32 = arith.constant 0 : i32
    %c0_i32_0 = arith.constant 0 : i32
    %c0_i32_1 = arith.constant 0 : i32
    return %c0_i32, %c0_i32_0 : i32, i32
  }
  func.func @transform_5(%arg0: i32) -> (i32, i32, i32) {
    %c0_i32 = arith.constant 0 : i32
    %c0_i32_0 = arith.constant 0 : i32
    %c0_i32_1 = arith.constant 0 : i32
    return %arg0, %c0_i32, %c0_i32_0 : i32, i32, i32
  }
}

</mosaic_0001>

<bundles_post_ra>
// kernel: _forward_impl.1
= control target key start
LH: loop header
LB: loop body
LE: loop exit
PB: predicated region body
PF: predicated region fallthrough
CT: control target
= control target key end

     0   :  { %s1947_s18 = smov 0   ;;  %s2246_s0 = inlined_call_operand.vmem [shape: s32[2,64,1], index: 0, kind: input, shape index: {}]   ;;  %s2247_s1 = inlined_call_operand.vmem [shape: f32[16,128], index: 1, kind: input, shape index: {}]   ;;  %s2248_s2 = inlined_call_operand.vmem [shape: f32[32,128], index: 2, kind: input, shape index: {}]   ;;  %s2249_s3 = inlined_call_operand.vmem [shape: f32[32,128], index: 3, kind: input, shape index: {}]   ;;  %s2250_s4 = inlined_call_operand.vmem [shape: f32[1,128], index: 4, kind: input, shape index: {}]   ;;  %s2251_s5 = inlined_call_operand.vmem [shape: f32[2,64,128], index: 5, kind: output, shape index: {}]  }
   0x1 LB: > { %s1490_s19 = sadd.s32 4294967295, %s1909_s18   ;;  %p1494_p0 = scmp.ge.s32.totalorder %s1909_s18, 1  ;;  %s1909_s18 = sphi %s1947_s18, %s15_s18  }
   0x2   : > { %p187_p1 = scmp.lt.s32.totalorder %s1909_s18, 3 }
   0x4   : > { %p188_p2 = pnand %p1494_p0, %p187_p1 }
   0x5   : > { %p215_p3 = scmp.lt.s32.totalorder (!%p188_p2), %s1490_s19, 1  ;;  %v1911_v0 = vmov (!%p188_p2), 0   ;;  %v283_v5 = vld [vmem:[%s2247_s1] sm:$0xff] (!%p188_p2)  ;;  %v284_v6 = vld [vmem:[%s2247_s1 + $0x8] sm:$0xff] (!%p188_p2)  ;;  %v1912_v10 = vmov (!%p188_p2), 0.0|0.0   ;;  %v233_v11 = vlaneseq (!%p188_p2)  ;;  %vm285_vm0 = vcmask (!%p188_p2), 130048  }
   0x6   : > { %191 = sbr.rel (%p188_p2) target bundleno = 6307 (0x18a3), region = 40  ;;  %1806 = vset.pattern.permute.xlu1 (!%p188_p2), %v1911_v0  ;;  %1805 = vset.pattern.permute.xlu0 (!%p188_p2), %v1911_v0  ;;  %v1729_v7 = vpack.c.bf16 (!%p188_p2), %v284_v6, %v283_v5  ;;  %v415_v15 = vld [vmem:[%s2248_s2] sm:$0xff] (!%p188_p2)  ;;  %v416_v16 = vld [vmem:[%s2248_s2 + $0x8] sm:$0xff] (!%p188_p2)  ;;  %v1913_v17 = vmov (!%p188_p2), 0.0   ;;  %v417_v22 = vld [vmem:[%s2248_s2 + $0x10] sm:$0xff] (!%p188_p2)  ;;  %vm1914_vm7 = vmmov (!%p188_p2), 0  }
   0x7   : > { %v1979_v12 = vand.u32 (!%p188_p2), 127, %v233_v11  ;;  %v1991_v21 = vpack.c.bf16 (!%p188_p2), %v416_v16, %v415_v15  ;;  %v418_v23 = vld [vmem:[%s2248_s2 + $0x18] sm:$0xff] (!%p188_p2)  ;;  %s1915_s11 = smov (!%p188_p2), 64   ;;  %s1916_s12 = smov (!%p188_p2), 32   ;;  %vm419_vm8 = vcmask (!%p188_p2), 261120  }
   0x8   : > { %1789 = vmatprep.subr.bf16.mxu1 (!%p188_p2), %v1729_v7  ;;  %1730 = vmatprep.subr.bf16.mxu0 (!%p188_p2), %v1729_v7  ;;  %v2006_v28 = vpack.c.bf16 (!%p188_p2), %v418_v23, %v417_v22 }
   0x9   : > { %1790 = vmatpush3.bf16.msra.mxu1 (!%p188_p2), %v1729_v7  ;;  %1732 = vmatpush3.bf16.msra.mxu0 (!%p188_p2), %v1729_v7 }
   0xa   : > { %1733 = vmatprep.subr.bf16.mxu1 (!%p188_p2), %v1912_v10  ;;  %1745 = vmatprep.subr.bf16.mxu0 (!%p188_p2), %v1912_v10 }
   0xd   : > { %s2253_s19 = smov (!%p215_p3, %s1490_s19), 1 }
   0xe   : > { %s1541_s20 = sshll.u32 %s2253_s19, 6 }
   0xf   : > { %s1963_s23 = scalar_lea.vmem %s2246_s0, %s1541_s20  ;;  %s2219_s28 = scalar_lea.vmem %s2251_s5, %s1541_s20 }
  0x10   : > { %v231_v1 = vld [vmem:[%s1963_s23 + $0x30] sm:$0xff]  ;;  %v229_v2 = vld [vmem:[%s1963_s23 + $0x20] sm:$0xff]  ;;  %v232_v3 = vld [vmem:[%s1963_s23 + $0x38] sm:$0xff] }
  0x11   : > { %254 = vperm.xlu1 %1806, %v231_v1   ;;  %248 = vperm.xlu0 %1805, %v229_v2   ;;  %v230_v4 = vld [vmem:[%s1963_s23 + $0x28] sm:$0xff]  ;;  %v225_v9 = vld [vmem:[%s1963_s23] sm:$0xff]  ;;  %v227_v1 = vld [vmem:[%s1963_s23 + $0x10] sm:$0xff] }
  0x12   : > { %v226_v8 = vld [vmem:[%s1963_s23 + $0x8] sm:$0xff]  ;;  %v228_v6 = vld [vmem:[%s1963_s23 + $0x18] sm:$0xff] }
  0x15   : > { %257 = vperm.xlu1 %1806, %v232_v3   ;;  %251 = vperm.xlu0 %1805, %v230_v4  }
  0x19   : > { %239 = vperm.xlu1 %1806, %v226_v8   ;;  %236 = vperm.xlu0 %1805, %v225_v9  }
  0x90   : > { %v255_v13 = vpop.permute.xlu1 %254  ;;  %v249_v14 = vpop.permute.xlu0 %248 }
  0x91   : > { %vm263_vm1 = vcmp.eq.s32.totalorder %v1979_v12, %v249_v14  ;;  %vm265_vm2 = vcmp.eq.s32.totalorder %v1979_v12, %v255_v13 }
  0x92   : > { %v1503_v18 = vsel %vm263_vm1, 1.0, %v1913_v17  ;;  %v1505_v25 = vsel %vm265_vm2, 1.0, %v1913_v17 }
  0x93   : > { %1615 = vmatprep.mubr.msk.f32.mxu1 %vm285_vm0, %v1503_v18 }
  0x94   : > { %v258_v19 = vpop.permute.xlu1 %257  ;;  %v252_v20 = vpop.permute.xlu0 %251 }
  0x95   : > { %vm264_vm3 = vcmp.eq.s32.totalorder %v1979_v12, %v252_v20  ;;  %vm266_vm4 = vcmp.eq.s32.totalorder %v1979_v12, %v258_v19 }
  0x96   : > { %v1504_v24 = vsel %vm264_vm3, 1.0, %v1913_v17  ;;  %v1506_v29 = vsel %vm266_vm4, 1.0, %v1913_v17 }
  0x97   : > { %1616 = vmatmul.mubr.msk.f32.vlgmr.msra.gmra.mrb[0].mxu1 %vm285_vm0, %v1504_v24 }
  0x98   : > { %1735 = vmatpush3.bf16.msra.mxu1 %v1991_v21  ;;  %1618 = vmatprep.mubr.msk.f32.mxu1 %vm285_vm0, %v1505_v25  ;;  %v240_v26 = vpop.permute.xlu1 %239  ;;  %v237_v27 = vpop.permute.xlu0 %236 }
  0x99   : > { %vm260_vm5 = vcmp.eq.s32.totalorder %v1979_v12, %v240_v26  ;;  %vm259_vm6 = vcmp.eq.s32.totalorder %v1979_v12, %v237_v27  ;;  %1736 = vmatprep.subr.bf16.mxu1 %v1912_v10 }
  0x9a   : > { %v1500_v30 = vsel %vm260_vm5, 1.0, %v1913_v17  ;;  %v1499_v31 = vsel %vm259_vm6, 1.0, %v1913_v17 }
  0x9b   : > { %1609 = vmatprep.mubr.msk.f32.mxu0 %vm285_vm0, %v1499_v31  ;;  %1619 = vmatmul.mubr.msk.f32.gmra.mrb[2].mxu1 %vm285_vm0, %v1506_v29 }
  0x9c   : > { %1738 = vmatpush3.bf16.msra.mxu1 %v2006_v28  ;;  %1610 = vmatmul.mubr.msk.f32.vlgmr.msra.gmra.mrb[0].mxu0 %vm285_vm0, %v1500_v30 }
  0x9d   : > { %1629 = vmatprep.mubr.msk.f32.mxu1 %vm1914_vm7, %v1913_v17  ;;  %1739 = vmatprep.subr.bf16.mxu1 %v1912_v10 }
  0x9e   : > { %1747 = vmatpush3.bf16.msra.mxu0 %v1991_v21 }
  0x9f   : > { %1630 = vmatmul.mubr.f32.vlgmr.msra.gmra.mrb[4].mxu1 %v1913_v17  ;;  %1748 = vmatprep.subr.bf16.mxu0 %v1912_v10 }
  0xa0   : > { %1741 = vmatpush3.bf16.msra.mxu1 %v1991_v21  ;;  %1640 = vmatprep.mubr.msk.f32.mxu1 %vm1914_vm7, %v1913_v17 }
  0xa1   : > { %1742 = vmatprep.subr.bf16.mxu1 %v1912_v10 }
  0xa2   : > { %1750 = vmatpush3.bf16.msra.mxu0 %v2006_v28 }
  0xa3   : > { %1757 = vmatprep.subr.bf16.mxu0 %v1912_v10 }
  0xa4   : > { %1744 = vmatpush3.bf16.msra.mxu1 %v2006_v28 }
  0xa5   : > { %1751 = vmatprep.subr.bf16.mxu1 %v1912_v10 }
 0x16a   : > { %v2032_v32 = vpop.f32.mrb[0].mxu1 }
 0x16b   : > { %v2034_v33 = vpop.f32.mrb[1].mxu1 }
 0x16e   : > { %v2036_v34 = vpop.f32.mrb[2].mxu1 }
 0x16f   : > { %v1611_v35 = vpop.f32.mrb[0].mxu0  ;;  %v2038_v36 = vpop.f32.mrb[3].mxu1 }
 0x170   : > { %v376_v37 = vpop.f32.mrb[1].mxu0 }
 0x172   : > { %v489_v38 = vpop.f32.mrb[4].mxu1 }
 0x173   : > { %v493_v39 = vadd.f32 %v489_v38, %v376_v37  ;;  %v1631_v40 = vpop.f32.mrb[5].mxu1 }
 0x175   : > { %1807 = vtanh.f32 %v493_v39  ;;  %v1515_v42 = vmul.f32 -1.442695, %v493_v39 }
 0x177   : > { %1809 = vpow2.f32 %v1515_v42 }
 0x17f   : > { %v1808_v41 = vpop.eup %1807 }
 0x180   : > { %503 = vrot.lane.b32.xlu0 %v1808_v41, %s1915_s11 }
 0x181   : > { %v1810_v43 = vpop.eup %1809 }
 0x182   : > { %v497_v44 = vadd.f32 1.0, %v1810_v43 }
 0x184   : > { %1811 = vrcp.f32 %v497_v44 }
 0x18e   : > { %v1812_v45 = vpop.eup %1811 }
 0x18f   : > { %v501_v48 = vmul.f32 0.0, %v1812_v45 }
 0x1f2   : > { %v504_v46 = vpop.permute.xlu0 %503 }
 0x1f3   : > { %v506_v47 = vmul.f32 %v1812_v45, %v504_v46 }
 0x1f5   : > { %508 = vrot.lane.b32.xlu1 %v506_v47, %s1916_s12 }
 0x267   : > { %v509_v49 = vpop.permute.xlu1 %508 }
 0x268   : > { %v511_v50 = vadd.f32 %v509_v49, %v501_v48 }
 0x26a   : > { %1813 = vtanh.f32 %v511_v50 }
 0x274   : > { %v1814_v51 = vpop.eup %1813 }
 0x275   : > { %514 = vrot.lane.b32.xlu0 %v1814_v51, %s1915_s11 }
 0x2e7   : > { %v515_v52 = vpop.permute.xlu0 %514 }
 0x2e8   : > { %v517_v53 = vmul.f32 %v1812_v45, %v515_v52 }
 0x2ea   : > { %519 = vrot.lane.b32.xlu1 %v517_v53, %s1916_s12 }
 0x35c   : > { %v2044_v54 = vpop.permute.xlu1 %519 }
 0x35d   : > { %1641 = vmatmul.mubr.msk.f32.vlgmr.msra.gmra.mrb[6].mxu1 %vm419_vm8, %v2044_v54 }
 0x35e   : > { %1753 = vmatpush3.bf16.msra.mxu1 %v1991_v21  ;;  %1662 = vmatprep.mubr.msk.f32.mxu1 %vm1914_vm7, %v1913_v17 }
 0x35f   : > { %1754 = vmatprep.subr.bf16.mxu1 %v1912_v10 }
 0x362   : > { %1756 = vmatpush3.bf16.msra.mxu1 %v2006_v28 }
 0x363   : > { %1763 = vmatprep.subr.bf16.mxu1 %v1912_v10 }
 0x430   : > { %v589_v55 = vpop.f32.mrb[6].mxu1 }
 0x431   : > { %v593_v56 = vadd.f32 %v1611_v35, %v589_v55  ;;  %v1642_v57 = vpop.f32.mrb[7].mxu1 }
 0x433   : > { %1815 = vtanh.f32 %v593_v56  ;;  %v1517_v59 = vmul.f32 -1.442695, %v593_v56 }
 0x435   : > { %1817 = vpow2.f32 %v1517_v59 }
 0x43d   : > { %v1816_v58 = vpop.eup %1815 }
 0x43e   : > { %603 = vrot.lane.b32.xlu0 %v1816_v58, %s1915_s11 }
 0x43f   : > { %v1818_v60 = vpop.eup %1817 }
 0x440   : > { %v597_v61 = vadd.f32 1.0, %v1818_v60 }
 0x442   : > { %1819 = vrcp.f32 %v597_v61 }
 0x44c   : > { %v1820_v62 = vpop.eup %1819 }
 0x44d   : > { %v601_v2 = vmul.f32 %v1820_v62, %v511_v50 }
 0x4b0   : > { %v604_v63 = vpop.permute.xlu0 %603 }
 0x4b1   : > { %v606_v0 = vmul.f32 %v1820_v62, %v604_v63 }
 0x4b3   : > { %608 = vrot.lane.b32.xlu1 %v606_v0, %s1916_s12 }
 0x4b7   : > { %242 = vperm.xlu1 %1806, %v227_v1  }
 0x525   : > { %v609_v3 = vpop.permute.xlu1 %608 }
 0x526   : > { %v611_v4 = vadd.f32 %v609_v3, %v601_v2 }
 0x528   : > { %1821 = vtanh.f32 %v611_v4 }
 0x532   : > { %v1822_v5 = vpop.eup %1821 }
 0x533   : > { %614 = vrot.lane.b32.xlu0 %v1822_v5, %s1915_s11 }
 0x536   : > { %v243_v7 = vpop.permute.xlu1 %242 }
 0x537   : > { %vm261_vm9 = vcmp.eq.s32.totalorder %v1979_v12, %v243_v7  ;;  %245 = vperm.xlu0 %1805, %v228_v6  }
 0x538   : > { %v1501_v8 = vsel %vm261_vm9, 1.0, %v1913_v17 }
 0x539   : > { %1612 = vmatprep.mubr.msk.f32.mxu0 %vm285_vm0, %v1501_v8 }
 0x5a5   : > { %v615_v9 = vpop.permute.xlu0 %614 }
 0x5a6   : > { %v617_v11 = vmul.f32 %v1820_v62, %v615_v9 }
 0x5a8   : > { %619 = vrot.lane.b32.xlu1 %v617_v11, %s1916_s12 }
 0x5b6   : > { %v246_v13 = vpop.permute.xlu0 %245 }
 0x5b7   : > { %vm262_vm10 = vcmp.eq.s32.totalorder %v1979_v12, %v246_v13 }
 0x5b8   : > { %v1502_v14 = vsel %vm262_vm10, 1.0, %v1913_v17 }
 0x5b9   : > { %1613 = vmatmul.mubr.msk.f32.gmra.mrb[2].mxu0 %vm285_vm0, %v1502_v14 }
 0x5ba   : > { %1651 = vmatprep.mubr.msk.f32.mxu0 %vm1914_vm7, %v1913_v17 }
 0x61a   : > { %v2068_v15 = vpop.permute.xlu1 %619 }
 0x61b   : > { %1652 = vmatmul.mubr.msk.f32.vlgmr.msra.gmra.mrb[4].mxu0 %vm419_vm8, %v2068_v15 }
 0x61c   : > { %1759 = vmatpush3.bf16.msra.mxu0 %v1991_v21  ;;  %1673 = vmatprep.mubr.msk.f32.mxu0 %vm1914_vm7, %v1913_v17 }
 0x61d   : > { %1760 = vmatprep.subr.bf16.mxu0 %v1912_v10 }
 0x620   : > { %1762 = vmatpush3.bf16.msra.mxu0 %v2006_v28 }
 0x621   : > { %1769 = vmatprep.subr.bf16.mxu0 %v1912_v10 }
 0x68c   : > { %v1614_v12 = vpop.f32.mrb[2].mxu0 }
 0x68d   : > { %v386_v16 = vpop.f32.mrb[3].mxu0 }
 0x6ee   : > { %v689_v18 = vpop.f32.mrb[4].mxu0 }
 0x6ef   : > { %v693_v19 = vadd.f32 %v689_v18, %v386_v16  ;;  %v1653_v20 = vpop.f32.mrb[5].mxu0 }
 0x6f1   : > { %1823 = vtanh.f32 %v693_v19  ;;  %v1519_v23 = vmul.f32 -1.442695, %v693_v19 }
 0x6f3   : > { %1825 = vpow2.f32 %v1519_v23 }
 0x6fb   : > { %v1824_v22 = vpop.eup %1823 }
 0x6fc   : > { %703 = vrot.lane.b32.xlu0 %v1824_v22, %s1915_s11 }
 0x6fd   : > { %v1826_v24 = vpop.eup %1825 }
 0x6fe   : > { %v697_v25 = vadd.f32 1.0, %v1826_v24  ;;  %v1219_v24 = vld [vmem:[%s2249_s3 + $0x8] sm:$0xff] }
 0x700   : > { %1827 = vrcp.f32 %v697_v25 }
 0x70a   : > { %v1828_v26 = vpop.eup %1827 }
 0x70b   : > { %v701_v30 = vmul.f32 %v1828_v26, %v611_v4 }
 0x76e   : > { %v704_v27 = vpop.permute.xlu0 %703 }
 0x76f   : > { %v706_v29 = vmul.f32 %v1828_v26, %v704_v27 }
 0x771   : > { %708 = vrot.lane.b32.xlu1 %v706_v29, %s1916_s12 }
 0x7e3   : > { %v709_v31 = vpop.permute.xlu1 %708 }
 0x7e4   : > { %v711_v35 = vadd.f32 %v709_v31, %v701_v30  ;;  %v1220_v30 = vld [vmem:[%s2249_s3 + $0x10] sm:$0xff]  ;;  %v1221_v31 = vld [vmem:[%s2249_s3 + $0x18] sm:$0xff] }
 0x7e6   : > { %1829 = vtanh.f32 %v711_v35 }
 0x7f0   : > { %v1830_v37 = vpop.eup %1829 }
 0x7f1   : > { %714 = vrot.lane.b32.xlu0 %v1830_v37, %s1915_s11 }
 0x863   : > { %v715_v38 = vpop.permute.xlu0 %714 }
 0x864   : > { %v717_v39 = vmul.f32 %v1828_v26, %v715_v38 }
 0x866   : > { %719 = vrot.lane.b32.xlu1 %v717_v39, %s1916_s12 }
 0x8d8   : > { %v2082_v40 = vpop.permute.xlu1 %719 }
 0x8d9   : > { %1663 = vmatmul.mubr.msk.f32.vlgmr.msra.gmra.mrb[8].mxu1 %vm419_vm8, %v2082_v40 }
 0x8da   : > { %1765 = vmatpush3.bf16.msra.mxu1 %v1991_v21  ;;  %1684 = vmatprep.mubr.msk.f32.mxu1 %vm1914_vm7, %v1913_v17 }
 0x8db   : > { %1766 = vmatprep.subr.bf16.mxu1 %v1912_v10 }
 0x8de   : > { %1768 = vmatpush3.bf16.msra.mxu1 %v2006_v28 }
 0x8df   : > { %1775 = vmatprep.subr.bf16.mxu1 %v1912_v10 }
 0x9ac   : > { %v789_v41 = vpop.f32.mrb[8].mxu1 }
 0x9ad   : > { %v793_v42 = vadd.f32 %v1614_v12, %v789_v41  ;;  %v1664_v43 = vpop.f32.mrb[9].mxu1 }
 0x9af   : > { %1831 = vtanh.f32 %v793_v42  ;;  %v1521_v45 = vmul.f32 -1.442695, %v793_v42 }
 0x9b1   : > { %1833 = vpow2.f32 %v1521_v45 }
 0x9b9   : > { %v1832_v44 = vpop.eup %1831 }
 0x9ba   : > { %803 = vrot.lane.b32.xlu0 %v1832_v44, %s1915_s11 }
 0x9bb   : > { %v1834_v46 = vpop.eup %1833 }
 0x9bc   : > { %v797_v47 = vadd.f32 1.0, %v1834_v46 }
 0x9be   : > { %1835 = vrcp.f32 %v797_v47 }
 0x9c8   : > { %v1836_v48 = vpop.eup %1835 }
 0x9c9   : > { %v801_v51 = vmul.f32 %v1836_v48, %v711_v35  ;;  %v1785_v35 = vpack.c.bf16 %v1221_v31, %v1220_v30 }
 0xa2c   : > { %v804_v49 = vpop.permute.xlu0 %803 }
 0xa2d   : > { %v806_v50 = vmul.f32 %v1836_v48, %v804_v49 }
 0xa2f   : > { %808 = vrot.lane.b32.xlu1 %v806_v50, %s1916_s12 }
 0xaa1   : > { %v809_v52 = vpop.permute.xlu1 %808 }
 0xaa2   : > { %v811_v53 = vadd.f32 %v809_v52, %v801_v51 }
 0xaa4   : > { %1837 = vtanh.f32 %v811_v53 }
 0xaae   : > { %v1838_v55 = vpop.eup %1837 }
 0xaaf   : > { %814 = vrot.lane.b32.xlu0 %v1838_v55, %s1915_s11 }
 0xb21   : > { %v815_v56 = vpop.permute.xlu0 %814 }
 0xb22   : > { %v817_v57 = vmul.f32 %v1836_v48, %v815_v56 }
 0xb24   : > { %819 = vrot.lane.b32.xlu1 %v817_v57, %s1916_s12 }
 0xb96   : > { %v2096_v58 = vpop.permute.xlu1 %819 }
 0xb97   : > { %1674 = vmatmul.mubr.msk.f32.vlgmr.msra.gmra.mrb[6].mxu0 %vm419_vm8, %v2096_v58 }
 0xb98   : > { %1771 = vmatpush3.bf16.msra.mxu0 %v1991_v21  ;;  %1695 = vmatprep.mubr.msk.f32.mxu0 %vm1914_vm7, %v1913_v17 }
 0xb99   : > { %1772 = vmatprep.subr.bf16.mxu0 %v1912_v10 }
 0xb9c   : > { %1774 = vmatpush3.bf16.msra.mxu0 %v2006_v28 }
 0xc6a   : > { %v889_v59 = vpop.f32.mrb[6].mxu0 }
 0xc6b   : > { %v893_v60 = vadd.f32 %v889_v59, %v2034_v33  ;;  %v1675_v61 = vpop.f32.mrb[7].mxu0 }
 0xc6d   : > { %1839 = vtanh.f32 %v893_v60  ;;  %v1523_v63 = vmul.f32 -1.442695, %v893_v60 }
 0xc6f   : > { %1841 = vpow2.f32 %v1523_v63 }
 0xc77   : > { %v1840_v62 = vpop.eup %1839 }
 0xc78   : > { %903 = vrot.lane.b32.xlu0 %v1840_v62, %s1915_s11 }
 0xc79   : > { %v1842_v0 = vpop.eup %1841 }
 0xc7a   : > { %v897_v1 = vadd.f32 1.0, %v1842_v0 }
 0xc7c   : > { %1843 = vrcp.f32 %v897_v1 }
 0xc86   : > { %v1844_v2 = vpop.eup %1843 }
 0xc87   : > { %v901_v5 = vmul.f32 %v1844_v2, %v811_v53 }
 0xcea   : > { %v904_v3 = vpop.permute.xlu0 %903 }
 0xceb   : > { %v906_v4 = vmul.f32 %v1844_v2, %v904_v3 }
 0xced   : > { %908 = vrot.lane.b32.xlu1 %v906_v4, %s1916_s12 }
 0xd5f   : > { %v909_v6 = vpop.permute.xlu1 %908 }
 0xd60   : > { %v911_v7 = vadd.f32 %v909_v6, %v901_v5 }
 0xd62   : > { %1845 = vtanh.f32 %v911_v7 }
 0xd6c   : > { %v1846_v33 = vpop.eup %1845 }
 0xd6d   : > { %914 = vrot.lane.b32.xlu0 %v1846_v33, %s1915_s11  ;;  %v1530_v33 = vld [vmem:[%s2250_s4] ss:$0 sm:$0xff] }
 0xddf   : > { %v915_v8 = vpop.permute.xlu0 %914 }
 0xde0   : > { %v917_v9 = vmul.f32 %v1844_v2, %v915_v8 }
 0xde2   : > { %919 = vrot.lane.b32.xlu1 %v917_v9, %s1916_s12 }
 0xe54   : > { %v920_v11 = vpop.permute.xlu1 %919 }
 0xe55   : > { %1685 = vmatmul.mubr.msk.f32.vlgmr.msra.gmra.mrb[10].mxu1 %vm419_vm8, %v920_v11 }
 0xe56   : > { %1777 = vmatpush3.bf16.msra.mxu1 %v1991_v21  ;;  %1706 = vmatprep.mubr.msk.f32.mxu1 %vm1914_vm7, %v1913_v17 }
 0xe57   : > { %1778 = vmatprep.subr.bf16.mxu1 %v1912_v10 }
 0xe5a   : > { %1780 = vmatpush3.bf16.msra.mxu1 %v2006_v28 }
 0xf28   : > { %v989_v13 = vpop.f32.mrb[10].mxu1 }
 0xf29   : > { %v993_v14 = vadd.f32 %v2032_v32, %v989_v13  ;;  %v1686_v12 = vpop.f32.mrb[11].mxu1  ;;  %v1218_v32 = vld [vmem:[%s2249_s3] sm:$0xff] }
 0xf2a   : > { %v1781_v25 = vpack.c.bf16 %v1219_v24, %v1218_v32 }
 0xf2b   : > { %1847 = vtanh.f32 %v993_v14  ;;  %v1525_v18 = vmul.f32 -1.442695, %v993_v14 }
 0xf2c   : > { %1782 = vmatprep.subr.bf16.mxu0 %v1781_v25 }
 0xf2d   : > { %1849 = vpow2.f32 %v1525_v18 }
 0xf35   : > { %v1848_v16 = vpop.eup %1847 }
 0xf36   : > { %1003 = vrot.lane.b32.xlu0 %v1848_v16, %s1915_s11 }
 0xf37   : > { %v1850_v19 = vpop.eup %1849 }
 0xf38   : > { %v997_v20 = vadd.f32 1.0, %v1850_v19 }
 0xf3a   : > { %1851 = vrcp.f32 %v997_v20 }
 0xf44   : > { %v1852_v21 = vpop.eup %1851 }
 0xf45   : > { %v1001_v10 = vmul.f32 %v1852_v21, %v911_v7 }
 0xfa8   : > { %v1004_v22 = vpop.permute.xlu0 %1003 }
 0xfa9   : > { %v1006_v17 = vmul.f32 %v1852_v21, %v1004_v22 }
 0xfab   : > { %1008 = vrot.lane.b32.xlu1 %v1006_v17, %s1916_s12 }
0x101d   : > { %v1009_v28 = vpop.permute.xlu1 %1008 }
0x101e   : > { %v1011_v23 = vadd.f32 %v1009_v28, %v1001_v10 }
0x1020   : > { %1853 = vtanh.f32 %v1011_v23 }
0x102a   : > { %v1854_v26 = vpop.eup %1853 }
0x102b   : > { %1014 = vrot.lane.b32.xlu0 %v1854_v26, %s1915_s11 }
0x109d   : > { %v1015_v27 = vpop.permute.xlu0 %1014 }
0x109e   : > { %v1017_v29 = vmul.f32 %v1852_v21, %v1015_v27 }
0x10a0   : > { %1019 = vrot.lane.b32.xlu1 %v1017_v29, %s1916_s12 }
0x1112   : > { %v1020_v37 = vpop.permute.xlu1 %1019 }
0x1113   : > { %1696 = vmatmul.mubr.msk.f32.vlgmr.msra.gmra.mrb[8].mxu0 %vm419_vm8, %v1020_v37 }
0x1114   : > { %1784 = vmatpush3.bf16.msra.mxu0 %v1781_v25  ;;  %1717 = vmatprep.mubr.msk.f32.mxu0 %vm419_vm8, %v2044_v54 }
0x1115   : > { %1786 = vmatprep.subr.bf16.mxu0 %v1785_v35 }
0x1118   : > { %1788 = vmatpush3.bf16.msra.mxu0 %v1785_v35 }
0x111b   : > { %1718 = vmatmul.mubr.msk.f32.vlgmr.msra.gmra.mrb[10].mxu0 %vm419_vm8, %v2068_v15 }
0x111c   : > { %1720 = vmatprep.mubr.msk.f32.mxu0 %vm419_vm8, %v2082_v40 }
0x111f   : > { %1721 = vmatmul.mubr.msk.f32.gmra.mrb[12].mxu0 %vm419_vm8, %v2096_v58 }
0x1120   : > { %1723 = vmatprep.mubr.msk.f32.mxu0 %vm419_vm8, %v920_v11 }
0x1123   : > { %1724 = vmatmul.mubr.msk.f32.gmra.mrb[14].mxu0 %vm419_vm8, %v1020_v37 }
0x11e6   : > { %v1089_v38 = vpop.f32.mrb[8].mxu0 }
0x11e7   : > { %v1093_v39 = vadd.f32 %v1089_v38, %v2038_v36  ;;  %v1697_v41 = vpop.f32.mrb[9].mxu0 }
0x11e9   : > { %1855 = vtanh.f32 %v1093_v39  ;;  %v1527_v46 = vmul.f32 -1.442695, %v1093_v39 }
0x11eb   : > { %1857 = vpow2.f32 %v1527_v46 }
0x11ee   : > { %v1719_v54 = vpop.f32.mrb[10].mxu0 }
0x11ef   : > { %v1300_v42 = vpop.f32.mrb[11].mxu0  ;;  %v2171_v16 = vadd.f32 %v1719_v54, %v1530_v33 }
0x11f0   : > { %v2158_v8 = vadd.f32 %v1530_v33, %v1300_v42 }
0x11f2   : > { %v1722_v43 = vpop.f32.mrb[12].mxu0 }
0x11f3   : > { %v1856_v44 = vpop.eup %1855  ;;  %v1310_v15 = vpop.f32.mrb[13].mxu0  ;;  %v2164_v11 = vadd.f32 %v1722_v43, %v1530_v33 }
0x11f4   : > { %1103 = vrot.lane.b32.xlu0 %v1856_v44, %s1915_s11  ;;  %v2161_v9 = vadd.f32 %v1530_v33, %v1310_v15 }
0x11f5   : > { %v1858_v47 = vpop.eup %1857 }
0x11f6   : > { %v1725_v40 = vpop.f32.mrb[14].mxu0  ;;  %v1097_v48 = vadd.f32 1.0, %v1858_v47 }
0x11f7   : > { %v1320_v45 = vpop.f32.mrb[15].mxu0  ;;  %v2167_v13 = vadd.f32 %v1725_v40, %v1530_v33 }
0x11f8   : > { %1859 = vrcp.f32 %v1097_v48  ;;  %v2174_v18 = vadd.f32 %v1530_v33, %v1320_v45 }
0x1202   : > { %v1860_v49 = vpop.eup %1859 }
0x1203   : > { %v1101_v36 = vmul.f32 %v1860_v49, %v1011_v23 }
0x1266   : > { %v1104_v50 = vpop.permute.xlu0 %1103 }
0x1267   : > { %v1106_v51 = vmul.f32 %v1860_v49, %v1104_v50 }
0x1269   : > { %1108 = vrot.lane.b32.xlu1 %v1106_v51, %s1916_s12 }
0x12db   : > { %v1109_v52 = vpop.permute.xlu1 %1108 }
0x12dc   : > { %v1111_v53 = vadd.f32 %v1109_v52, %v1101_v36 }
0x12de   : > { %1861 = vtanh.f32 %v1111_v53 }
0x12e8   : > { %v1862_v55 = vpop.eup %1861 }
0x12e9   : > { %1114 = vrot.lane.b32.xlu0 %v1862_v55, %s1915_s11 }
0x135b   : > { %v1115_v56 = vpop.permute.xlu0 %1114 }
0x135c   : > { %v1117_v57 = vmul.f32 %v1860_v49, %v1115_v56 }
0x135e   : > { %1119 = vrot.lane.b32.xlu1 %v1117_v57, %s1916_s12 }
0x13d0   : > { %v1120_v58 = vpop.permute.xlu1 %1119 }
0x13d1   : > { %1707 = vmatmul.mubr.msk.f32.vlgmr.msra.gmra.mrb[12].mxu1 %vm419_vm8, %v1120_v58  ;;  %1726 = vmatprep.mubr.msk.f32.mxu0 %vm419_vm8, %v1120_v58 }
0x14a4   : > { %v1189_v59 = vpop.f32.mrb[12].mxu1 }
0x14a5   : > { %v1193_v60 = vadd.f32 %v2036_v34, %v1189_v59  ;;  %v1708_v61 = vpop.f32.mrb[13].mxu1 }
0x14a7   : > { %1863 = vtanh.f32 %v1193_v60  ;;  %v1529_v63 = vmul.f32 -1.442695, %v1193_v60 }
0x14a9   : > { %1865 = vpow2.f32 %v1529_v63 }
0x14b1   : > { %v1864_v62 = vpop.eup %1863 }
0x14b2   : > { %1203 = vrot.lane.b32.xlu0 %v1864_v62, %s1915_s11 }
0x14b3   : > { %v1866_v0 = vpop.eup %1865 }
0x14b4   : > { %v1197_v1 = vadd.f32 1.0, %v1866_v0 }
0x14b6   : > { %1867 = vrcp.f32 %v1197_v1 }
0x14c0   : > { %v1868_v2 = vpop.eup %1867 }
0x14c1   : > { %v1201_v5 = vmul.f32 %v1868_v2, %v1111_v53 }
0x1524   : > { %v1204_v3 = vpop.permute.xlu0 %1203 }
0x1525   : > { %v1206_v4 = vmul.f32 %v1868_v2, %v1204_v3 }
0x1527   : > { %1208 = vrot.lane.b32.xlu1 %v1206_v4, %s1916_s12 }
0x1599   : > { %v1209_v6 = vpop.permute.xlu1 %1208 }
0x159a   : > { %v1211_v7 = vadd.f32 %v1209_v6, %v1201_v5 }
0x159c   : > { %1869 = vtanh.f32 %v1211_v7 }
0x15a6   : > { %v1870_v34 = vpop.eup %1869 }
0x15a7   : > { %1214 = vrot.lane.b32.xlu0 %v1870_v34, %s1915_s11 }
0x15c6   : > { %1339 = vmax.xlane.f32.xlu0 %v2158_v8 }
0x15ca   : > { %1343 = vmax.xlane.f32.xlu0 %v2161_v9 }
0x15ce   : > { %1345 = vmax.xlane.f32.xlu0 %v2164_v11 }
0x15d2   : > { %1349 = vmax.xlane.f32.xlu0 %v2167_v13 }
0x1619   : > { %v1215_v14 = vpop.permute.xlu0 %1214 }
0x161a   : > { %v1217_v12 = vmul.f32 %v1868_v2, %v1215_v14 }
0x161c   : > { %1230 = vrot.lane.b32.xlu1 %v1217_v12, %s1916_s12 }
0x1640   : > { %1341 = vmax.xlane.f32.xlu1 %v2171_v16 }
0x1644   : > { %1347 = vmax.xlane.f32.xlu1 %v2174_v18 }
0x1653   : > { %v2178_v20 = vpop.xlane.xlu0 %1339 }
0x1654   : > { %v1355_v28 = vsub.f32 %v2158_v8, %v2178_v20 }
0x1656   : > { %v1363_v24 = vmul.f32 1.442695, %v1355_v28 }
0x1657   : > { %v2180_v21 = vpop.xlane.xlu0 %1343 }
0x1658   : > { %v1357_v25 = vsub.f32 %v2161_v9, %v2180_v21 }
0x165a   : > { %v1367_v31 = vmul.f32 1.442695, %v1357_v25 }
0x165b   : > { %v2184_v17 = vpop.xlane.xlu0 %1345 }
0x165c   : > { %v1358_v23 = vsub.f32 %v2164_v11, %v2184_v17 }
0x165e   : > { %v1369_v29 = vmul.f32 1.442695, %v1358_v23 }
0x165f   : > { %v2194_v26 = vpop.xlane.xlu0 %1349 }
0x1660   : > { %v1360_v30 = vsub.f32 %v2167_v13, %v2194_v26 }
0x1662   : > { %v1373_v37 = vmul.f32 1.442695, %v1360_v30 }
0x168e   : > { %v1231_v19 = vpop.permute.xlu1 %1230 }
0x168f   : > { %1727 = vmatmul.mubr.msk.f32.gmra.mrb[16].mxu0 %vm419_vm8, %v1231_v19 }
0x16cd   : > { %v2182_v22 = vpop.xlane.xlu1 %1341 }
0x16ce   : > { %v1356_v10 = vsub.f32 %v2171_v16, %v2182_v22 }
0x16d0   : > { %v1365_v32 = vmul.f32 1.442695, %v1356_v10 }
0x16d1   : > { %v2196_v27 = vpop.xlane.xlu1 %1347 }
0x16d2   : > { %1871 = vpow2.f32 %v1365_v32  ;;  %v1359_v35 = vsub.f32 %v2174_v18, %v2196_v27 }
0x16d3   : > { %1873 = vpow2.f32 %v1363_v24 }
0x16d4   : > { %1875 = vpow2.f32 %v1369_v29  ;;  %v1371_v39 = vmul.f32 1.442695, %v1359_v35 }
0x16d5   : > { %1877 = vpow2.f32 %v1367_v31 }
0x16d6   : > { %1879 = vpow2.f32 %v1373_v37 }
0x16d7   : > { %1881 = vpow2.f32 %v1371_v39 }
0x16dc   : > { %v1872_v43 = vpop.eup %1871 }
0x16dd   : > { %v1874_v44 = vpop.eup %1873 }
0x16de   : > { %v1876_v15 = vpop.eup %1875 }
0x16df   : > { %v1878_v40 = vpop.eup %1877 }
0x16e0   : > { %v1880_v45 = vpop.eup %1879 }
0x16e1   : > { %v1882_v46 = vpop.eup %1881 }
0x1762   : > { %v1728_v38 = vpop.f32.mrb[16].mxu0 }
0x1763   : > { %v2202_v41 = vadd.f32 %v1728_v38, %v1530_v33  ;;  %v1330_v54 = vpop.f32.mrb[17].mxu0 }
0x1764   : > { %v2204_v42 = vadd.f32 %v1530_v33, %v1330_v54 }
0x1765   : > { %1353 = vmax.xlane.f32.xlu0 %v2202_v41 }
0x1766   : > { %1351 = vmax.xlane.f32.xlu1 %v2204_v42 }
0x1769   : > { %1381 = vadd.xlane.f32.xlu0 %v1872_v43 }
0x176a   : > { %1379 = vadd.xlane.f32.xlu1 %v1874_v44 }
0x176d   : > { %1385 = vadd.xlane.f32.xlu0 %v1876_v15 }
0x176e   : > { %1383 = vadd.xlane.f32.xlu1 %v1878_v40 }
0x1771   : > { %1389 = vadd.xlane.f32.xlu0 %v1880_v45 }
0x1772   : > { %1387 = vadd.xlane.f32.xlu1 %v1882_v46 }
0x17f2   : > { %v2208_v47 = vpop.xlane.xlu0 %1353 }
0x17f3   : > { %v1362_v48 = vsub.f32 %v2202_v41, %v2208_v47  ;;  %v1352_v49 = vpop.xlane.xlu1 %1351 }
0x17f4   : > { %v1361_v50 = vsub.f32 %v2204_v42, %v1352_v49 }
0x17f5   : > { %v1377_v51 = vmul.f32 1.442695, %v1362_v48 }
0x17f6   : > { %v1375_v36 = vmul.f32 1.442695, %v1361_v50  ;;  %v1382_v52 = vpop.xlane.xlu0 %1381 }
0x17f7   : > { %1883 = vpow2.f32 %v1377_v51  ;;  %v1380_v53 = vpop.xlane.xlu1 %1379 }
0x17f8   : > { %1885 = vpow2.f32 %v1375_v36 }
0x17f9   : > { %1887 = vlog2.f32 %v1382_v52 }
0x17fa   : > { %1889 = vlog2.f32 %v1380_v53  ;;  %v1386_v55 = vpop.xlane.xlu0 %1385 }
0x17fb   : > { %1891 = vlog2.f32 %v1386_v55  ;;  %v1384_v56 = vpop.xlane.xlu1 %1383 }
0x17fc   : > { %1893 = vlog2.f32 %v1384_v56 }
0x17fe   : > { %v1390_v57 = vpop.xlane.xlu0 %1389 }
0x17ff   : > { %1895 = vlog2.f32 %v1390_v57  ;;  %v1388_v58 = vpop.xlane.xlu1 %1387 }
0x1800   : > { %1897 = vlog2.f32 %v1388_v58 }
0x1801   : > { %v1884_v59 = vpop.eup %1883 }
0x1802   : > { %v1886_v60 = vpop.eup %1885  ;;  %1393 = vadd.xlane.f32.xlu0 %v1884_v59 }
0x1803   : > { %v1888_v61 = vpop.eup %1887  ;;  %1391 = vadd.xlane.f32.xlu1 %v1886_v60 }
0x1804   : > { %v1890_v62 = vpop.eup %1889  ;;  %v1398_v63 = vmul.f32 0.6931472, %v1888_v61 }
0x1805   : > { %v1892_v0 = vpop.eup %1891  ;;  %v1396_v1 = vmul.f32 0.6931472, %v1890_v62 }
0x1806   : > { %v1894_v2 = vpop.eup %1893  ;;  %v1412_v3 = vadd.f32 %v1398_v63, %v2182_v22  ;;  %v1402_v4 = vmul.f32 0.6931472, %v1892_v0 }
0x1807   : > { %v1411_v5 = vadd.f32 %v1396_v1, %v2178_v20  ;;  %v1400_v6 = vmul.f32 0.6931472, %v1894_v2 }
0x1808   : > { %v1420_v7 = vsub.f32 %v2171_v16, %v1412_v3  ;;  %v1414_v34 = vadd.f32 %v1402_v4, %v2184_v17 }
0x1809   : > { %v1896_v33 = vpop.eup %1895  ;;  %v1419_v14 = vsub.f32 %v2158_v8, %v1411_v5  ;;  %v1413_v12 = vadd.f32 %v1400_v6, %v2180_v21 }
0x180a   : > { %v1898_v19 = vpop.eup %1897  ;;  %1428 = vst [vmem:[%s2219_s28 + $0x8] sm:$0xff] %v1420_v7  ;;  %v1422_v22 = vsub.f32 %v2164_v11, %v1414_v34  ;;  %v1406_v10 = vmul.f32 0.6931472, %v1896_v33 }
0x180b   : > { %1427 = vst [vmem:[%s2219_s28] sm:$0xff] %v1419_v14  ;;  %v1421_v20 = vsub.f32 %v2161_v9, %v1413_v12  ;;  %v1404_v28 = vmul.f32 0.6931472, %v1898_v19 }
0x180c   : > { %1430 = vst [vmem:[%s2219_s28 + $0x18] sm:$0xff] %v1422_v22  ;;  %v1416_v16 = vadd.f32 %v1406_v10, %v2194_v26 }
0x180d   : > { %1429 = vst [vmem:[%s2219_s28 + $0x10] sm:$0xff] %v1421_v20  ;;  %v1415_v17 = vadd.f32 %v1404_v28, %v2196_v27 }
0x180e   : > { %v1424_v8 = vsub.f32 %v2167_v13, %v1416_v16 }
0x180f   : > { %v1423_v21 = vsub.f32 %v2174_v18, %v1415_v17 }
0x1810   : > { %1432 = vst [vmem:[%s2219_s28 + $0x28] sm:$0xff] %v1424_v8 }
0x1811   : > { %1431 = vst [vmem:[%s2219_s28 + $0x20] sm:$0xff] %v1423_v21 }
0x188f   : > { %v1394_v11 = vpop.xlane.xlu0 %1393 }
0x1890   : > { %1899 = vlog2.f32 %v1394_v11  ;;  %v1392_v23 = vpop.xlane.xlu1 %1391 }
0x1891   : > { %1901 = vlog2.f32 %v1392_v23 }
0x189a   : > { %v1900_v9 = vpop.eup %1899 }
0x189b   : > { %v1902_v32 = vpop.eup %1901  ;;  %v1410_v24 = vmul.f32 0.6931472, %v1900_v9 }
0x189c   : > { %v1408_v25 = vmul.f32 0.6931472, %v1902_v32 }
0x189d   : > { %v1418_v26 = vadd.f32 %v1410_v24, %v2208_v47 }
0x189e   : > { %v1417_v29 = vadd.f32 %v1408_v25, %v1352_v49 }
0x189f   : > { %v1426_v27 = vsub.f32 %v2202_v41, %v1418_v26 }
0x18a0   : > { %v1425_v13 = vsub.f32 %v2204_v42, %v1417_v29 }
0x18a1   : > { %1434 = vst [vmem:[%s2219_s28 + $0x38] sm:$0xff] %v1426_v27 }
0x18a2   : > { %1433 = vst [vmem:[%s2219_s28 + $0x30] sm:$0xff] %v1425_v13 }
0x18a3 PF: > { %s15_s18 = sadd.s32 1, %s1909_s18  }
0x18a4   : > { %p12_p4 = scmp.ge.s32.totalorder %s15_s18, 4  }
0x18a6   :  { %14 = sbr.rel (!%p12_p4) target bundleno = 1 (0x1), region = 70 }

</bundles_post_ra>
